<compile_context>
chip_gen: v7x
topology: tpu7x:2x2x1
jax: 0.10.0
libtpu: 0.0.40
codegen_flags: <defaults>
</compile_context>

<pallas_src>
import functools
import math

import jax
import jax.numpy as jnp
import numpy as np
from jax.experimental import pallas as pl
from jax.experimental.pallas import tpu as pltpu

_EPS = 1e-5                       # PyTorch BatchNorm1d default
_VMEM_LIMIT = 48 * 1024 * 1024    # <= ~75% of v7x's 64 MiB VMEM; also fine on v5e/v6e.


def _round_up(v: int, m: int) -> int:
    return ((v + m - 1) // m) * m


# --------------------------------------------------------------------------------------
# Phase 1: conv (im2col matmul) + ReLU + partial per-channel statistics
# --------------------------------------------------------------------------------------
def _conv_relu_stats_kernel(x_ref, w_ref, y_ref, sum_ref, ssq_ref, *, l_out, relu):
    # x_ref:   (tn, tl, K*C_in)   im2col columns for this tile (compute dtype)
    # w_ref:   (K*C_in, C_pad)    conv weight, tap-major rows, zero-padded lanes
    # y_ref:   (tn, tl, C_pad)    conv(+ReLU) activations, f32, lane-dense
    # sum_ref: (1, 1, C_pad)      resident per-N-tile accumulator of sum(y)
    # ssq_ref: (1, 1, C_pad)      resident per-N-tile accumulator of sum(y*y)
    j = pl.program_id(1)                    # L-tile index (statistics reduction axis)
    tn, tl, kc = x_ref.shape
    c_pad = w_ref.shape[1]

    # Single im2col matmul on the MXU (f32 accumulation).
    cols = x_ref[...].reshape(tn * tl, kc)
    y = jnp.dot(cols, w_ref[...], preferred_element_type=jnp.float32)
    if relu:
        y = jnp.maximum(y, 0.0)
    y_ref[...] = y.reshape(tn, tl, c_pad)

    # Partial per-channel statistics, fused into the conv epilogue.  Rows past l_out
    # (only present in a ragged last L tile) are masked out of the statistics; the
    # corresponding stored rows are sliced away by the wrapper.
    ys = y
    if l_out % tl != 0:                      # static: only emitted for ragged tiling
        l_local = jax.lax.broadcasted_iota(jnp.int32, (tn * tl, 1), 0) % tl
        ys = jnp.where(j * tl + l_local < l_out, y, 0.0)

    @pl.when(j == 0)
    def _init():
        sum_ref[...] = jnp.zeros_like(sum_ref)
        ssq_ref[...] = jnp.zeros_like(ssq_ref)

    sum_ref[...] += jnp.sum(ys, axis=0, keepdims=True).reshape(sum_ref.shape)
    ssq_ref[...] += jnp.sum(ys * ys, axis=0, keepdims=True).reshape(ssq_ref.shape)


# --------------------------------------------------------------------------------------
# Phase 2: apply folded BatchNorm affine (one FMA per element)
# --------------------------------------------------------------------------------------
def _bn_apply_kernel(y_ref, aff_ref, o_ref):
    aff = aff_ref[...]                               # (2, C_pad): row0=scale, row1=shift
    scale = aff[0:1, :].reshape(1, 1, -1)
    shift = aff[1:2, :].reshape(1, 1, -1)
    o_ref[...] = y_ref[...] * scale + shift


# --------------------------------------------------------------------------------------
# Wrapper
# --------------------------------------------------------------------------------------
@functools.partial(jax.jit, static_argnames=("relu", "tl", "tn", "compute_dtype"))
def batch_norm_conv(x, weight, gamma, beta, *, relu=True, tl=256, tn=None,
                    compute_dtype=jnp.bfloat16):
    """x: (N, C_in, L) f32 (PyTorch NCL). weight: (C_out, C_in, K). Returns (N, C_out, L_out)."""
    n, c_in, l = x.shape
    c_out, c_in_w, k = weight.shape
    assert c_in_w == c_in
    pad = k // 2
    l_out = l + 2 * pad - k + 1

    # ---- static tiling parameters -----------------------------------------------------
    c_pad = _round_up(c_out, 128)                 # lane-dense channel axis
    tl = _round_up(min(tl, l_out), 8)             # L tile (sublane axis), multiple of 8
    t = pl.cdiv(l_out, tl)
    l_total = t * tl
    if tn is None:
        tn = math.gcd(n, 8)
    assert n % tn == 0, "batch tile size must divide the batch"
    nt = n // tn

    # ---- wrapper glue: transpose + pad + im2col columns + bf16 cast (one fused XLA pass)
    x_nlc = jnp.transpose(x, (0, 2, 1))                                         # (N, L, C_in)
    x_pad = jnp.pad(x_nlc, ((0, 0), (pad, l_total + k - 1 - pad - l), (0, 0)))  # (N, l_total+K-1, C_in)
    x_col = jnp.concatenate([x_pad[:, kk:kk + l_total, :] for kk in range(k)],
                            axis=-1).astype(compute_dtype)                      # (N, l_total, K*C_in)

    w_col = jnp.transpose(weight, (2, 1, 0)).reshape(k * c_in, c_out)           # tap-major rows
    w_col = jnp.pad(w_col, ((0, 0), (0, c_pad - c_out))).astype(compute_dtype)  # (K*C_in, C_pad)
    gamma_p = jnp.pad(gamma.astype(jnp.float32), (0, c_pad - c_out))
    beta_p = jnp.pad(beta.astype(jnp.float32), (0, c_pad - c_out))

    # ---- phase 1: conv (+ReLU) + partial per-channel sum / sum-of-squares --------------
    kern1 = functools.partial(_conv_relu_stats_kernel, l_out=l_out, relu=relu)
    y, psum, pssq = pl.pallas_call(
        kern1,
        grid=(nt, t),
        in_specs=[
            pl.BlockSpec((tn, tl, k * c_in), lambda i, j: (i, j, 0)),
            pl.BlockSpec((k * c_in, c_pad), lambda i, j: (0, 0)),
        ],
        out_specs=(
            pl.BlockSpec((tn, tl, c_pad), lambda i, j: (i, j, 0)),
            pl.BlockSpec((1, 1, c_pad), lambda i, j: (i, 0, 0)),   # resident accumulator
            pl.BlockSpec((1, 1, c_pad), lambda i, j: (i, 0, 0)),   # resident accumulator
        ),
        out_shape=(
            jax.ShapeDtypeStruct((n, l_total, c_pad), jnp.float32),
            jax.ShapeDtypeStruct((nt, 1, c_pad), jnp.float32),
            jax.ShapeDtypeStruct((nt, 1, c_pad), jnp.float32),
        ),
        compiler_params=pltpu.CompilerParams(
            dimension_semantics=("parallel", "arbitrary"),   # L axis is the stats reduction
            vmem_limit_bytes=_VMEM_LIMIT),
    )(x_col, w_col)

    # ---- fold BatchNorm into one per-channel scale / shift (tiny O(C) math) ------------
    count = float(n * l_out)
    mean = jnp.sum(psum, axis=(0, 1)) / count
    var = jnp.maximum(jnp.sum(pssq, axis=(0, 1)) / count - mean * mean, 0.0)
    scale = gamma_p * jax.lax.rsqrt(var + _EPS)
    shift = beta_p - mean * scale
    affine = jnp.stack([scale, shift], axis=0)                           # (2, C_pad)

    # ---- phase 2: normalize; phase-1 activation buffer reused in place -----------------
    out = pl.pallas_call(
        _bn_apply_kernel,
        grid=(nt, t),
        in_specs=[
            pl.BlockSpec((tn, tl, c_pad), lambda i, j: (i, j, 0)),
            pl.BlockSpec((2, c_pad), lambda i, j: (0, 0)),
        ],
        out_specs=pl.BlockSpec((tn, tl, c_pad), lambda i, j: (i, j, 0)),
        out_shape=jax.ShapeDtypeStruct((n, l_total, c_pad), jnp.float32),
        input_output_aliases={0: 0},
        compiler_params=pltpu.CompilerParams(
            dimension_semantics=("parallel", "parallel"),
            vmem_limit_bytes=_VMEM_LIMIT),
    )(y, affine)

    # back to PyTorch NCL; drop channel / length padding.
    return jnp.transpose(out[:, :l_out, :c_out], (0, 2, 1))


# --------------------------------------------------------------------------------------
# Pure-JAX reference (forward semantics of the PyTorch module)
# --------------------------------------------------------------------------------------
def _reference(x, weight, gamma, beta, *, relu=True, compute_dtype=jnp.float32):
    pad = weight.shape[2] // 2
    y = jax.lax.conv_general_dilated(
        x.astype(compute_dtype), weight.astype(compute_dtype),
        window_strides=(1,), padding=[(pad, pad)],
        dimension_numbers=("NCH", "OIH", "NCH"),
        preferred_element_type=jnp.float32)
    if relu:
        y = jnp.maximum(y, 0.0)
    mean = jnp.mean(y, axis=(0, 2), keepdims=True)
    var = jnp.mean((y - mean) ** 2, axis=(0, 2), keepdims=True)
    return (y - mean) * jax.lax.rsqrt(var + _EPS) * gamma[None, :, None] + beta[None, :, None]


if __name__ == "__main__":
    N, C_IN, C_OUT, L = 2, 4, 8, 40

    key = jax.random.PRNGKey(0)
    kx, kw, kg, kb = jax.random.split(key, 4)
    x = jax.random.normal(kx, (N, C_IN, L), dtype=jnp.float32)
    gamma = 0.5 + jax.random.uniform(kg, (C_OUT,), dtype=jnp.float32)
    beta = 0.1 * jax.random.normal(kb, (C_OUT,), dtype=jnp.float32)

    cases = [
        # f32 compute, explicit small tiles -> grid (2, 3) with a ragged last L tile.
        dict(k=3, relu=True, compute_dtype=jnp.float32, tol=1e-4, kwargs=dict(tl=16, tn=1)),
        # bf16 compute path with default tiling parameters.
        dict(k=3, relu=True, compute_dtype=jnp.bfloat16, tol=1e-3, kwargs=dict()),
        # larger kernel, no ReLU.
        dict(k=5, relu=False, compute_dtype=jnp.float32, tol=1e-4, kwargs=dict(tl=16, tn=1)),
    ]

    for case in cases:
        k = case["k"]
        w = jax.random.normal(kw, (C_OUT, C_IN, k), dtype=jnp.float32) / np.sqrt(C_IN * k)
        out = batch_norm_conv(x, w, gamma, beta, relu=case["relu"],
                              compute_dtype=case["compute_dtype"], **case["kwargs"])
        out = jax.block_until_ready(out)
        ref = jax.block_until_ready(
            _reference(x, w, gamma, beta, relu=case["relu"],
                       compute_dtype=case["compute_dtype"]))
        l_out = L + 2 * (k // 2) - k + 1
        assert out.shape == (N, C_OUT, l_out), out.shape
        np.testing.assert_allclose(np.asarray(out), np.asarray(ref),
                                   rtol=case["tol"], atol=case["tol"])

    print("KERNEL_OK")
</pallas_src>

<mosaic_0001>
module attributes {stable_mosaic.version = 11 : i64} {
  func.func @_conv_relu_stats_kernel(%arg0: i32, %arg1: i32, %arg2: memref<1x16x12xf32, #tpu.memory_space<vmem>>, %arg3: memref<12x128xf32, #tpu.memory_space<vmem>>, %arg4: memref<1x16x128xf32, #tpu.memory_space<vmem>>, %arg5: memref<1x1x128xf32, #tpu.memory_space<vmem>>, %arg6: memref<1x1x128xf32, #tpu.memory_space<vmem>>) attributes {dimension_semantics = [#tpu.dimension_semantics<parallel>, #tpu.dimension_semantics<arbitrary>], iteration_bounds = array<i64: 2, 3>, scalar_prefetch = 0 : i64, scratch_operands = 0 : i64, tpu.core_type = #tpu.core_type<tc>, window_params = [{transform_indices = @transform_0, window_bounds = array<i64: 1, 16, 12>}, {pipeline_mode = #tpu.pipeline_mode<synchronous>, transform_indices = @transform_1, window_bounds = array<i64: 12, 128>}, {transform_indices = @transform_2, window_bounds = array<i64: 1, 16, 128>}, {transform_indices = @transform_3, window_bounds = array<i64: 1, 1, 128>}, {transform_indices = @transform_4, window_bounds = array<i64: 1, 1, 128>}]} {
    %c0 = arith.constant 0 : index
    %c0_0 = arith.constant 0 : index
    %c0_1 = arith.constant 0 : index
    %0 = vector.load %arg2[%c0, %c0_0, %c0_1] : memref<1x16x12xf32, #tpu.memory_space<vmem>>, vector<1x16x12xf32>
    %1 = vector.shape_cast %0 : vector<1x16x12xf32> to vector<16x12xf32>
    %c0_2 = arith.constant 0 : index
    %c0_3 = arith.constant 0 : index
    %2 = vector.load %arg3[%c0_2, %c0_3] : memref<12x128xf32, #tpu.memory_space<vmem>>, vector<12x128xf32>
    %cst = arith.constant dense<0.000000e+00> : vector<16x128xf32>
    %3 = tpu.matmul %1, %2, %cst {dimension_numbers = #tpu.dot_dimension_numbers<[1], [0], [0], [1], [0, 0, 1, 1], [], []>} : vector<16x12xf32>, vector<12x128xf32>, vector<16x128xf32> -> vector<16x128xf32>
    %cst_4 = arith.constant 0.000000e+00 : f32
    %4 = vector.broadcast %cst_4 : f32 to vector<16x128xf32>
    %5 = arith.maximumf %3, %4 : vector<16x128xf32>
    %6 = vector.shape_cast %5 : vector<16x128xf32> to vector<1x16x128xf32>
    %c0_5 = arith.constant 0 : index
    %c0_6 = arith.constant 0 : index
    %c0_7 = arith.constant 0 : index
    %7 = vector.load %arg4[%c0_5, %c0_6, %c0_7] : memref<1x16x128xf32, #tpu.memory_space<vmem>>, vector<1x16x128xf32>
    tpu.vector_store %arg4[%c0_5, %c0_6, %c0_7], %6 {strides = array<i32>} : memref<1x16x128xf32, #tpu.memory_space<vmem>>, vector<1x16x128xf32>,
    %8 = tpu.iota {dimensions = array<i32: 0>} : vector<16x1xi32>
    %c16_i32 = arith.constant 16 : i32
    %c0_i32 = arith.constant 0 : i32
    %9 = arith.cmpi eq, %c16_i32, %c0_i32 : i32
    %c1_i32 = arith.constant 1 : i32
    %10 = arith.select %9, %c1_i32, %c16_i32 : i32
    %11 = vector.broadcast %10 : i32 to vector<16x1xi32>
    %12 = arith.remsi %8, %11 : vector<16x1xi32>
    %c0_i32_8 = arith.constant 0 : i32
    %13 = vector.broadcast %c0_i32_8 : i32 to vector<16x1xi32>
    %14 = arith.cmpi ne, %12, %13 : vector<16x1xi32>
    %c0_i32_9 = arith.constant 0 : i32
    %15 = vector.broadcast %c0_i32_9 : i32 to vector<16x1xi32>
    %16 = arith.cmpi slt, %12, %15 : vector<16x1xi32>
    %c0_i32_10 = arith.constant 0 : i32
    %17 = arith.cmpi slt, %10, %c0_i32_10 : i32
    %18 = vector.broadcast %17 : i1 to vector<16x1xi1>
    %19 = vector.broadcast %18 : vector<16x1xi1> to vector<16x1xi1>
    %20 = arith.xori %16, %19 : vector<16x1xi1>
    %21 = arith.andi %20, %14 : vector<16x1xi1>
    %22 = vector.broadcast %10 : i32 to vector<16x1xi32>
    %23 = arith.addi %12, %22 : vector<16x1xi32>
    %24 = arith.select %21, %23, %12 : vector<16x1xi1>, vector<16x1xi32>
    %c16_i32_11 = arith.constant 16 : i32
    %25 = arith.muli %arg1, %c16_i32_11 : i32
    %26 = vector.broadcast %25 : i32 to vector<16x1xi32>
    %27 = arith.addi %26, %24 : vector<16x1xi32>
    %c40_i32 = arith.constant 40 : i32
    %28 = vector.broadcast %c40_i32 : i32 to vector<16x1xi32>
    %29 = arith.cmpi slt, %27, %28 : vector<16x1xi32>
    %cst_12 = arith.constant 0.000000e+00 : f32
    %30 = vector.shape_cast %29 : vector<16x1xi1> to vector<16x1xi1>
    %31 = vector.broadcast %30 : vector<16x1xi1> to vector<16x128xi1>
    %32 = vector.broadcast %cst_12 : f32 to vector<16x128xf32>
    %33 = arith.select %31, %5, %32 : vector<16x128xi1>, vector<16x128xf32>
    %c0_i32_13 = arith.constant 0 : i32
    %34 = arith.cmpi eq, %arg1, %c0_i32_13 : i32
    %35 = arith.extui %34 : i1 to i32
    %c0_i32_14 = arith.constant 0 : i32
    %36 = arith.cmpi ne, %35, %c0_i32_14 : i32
    scf.if %36 {
      %cst_29 = arith.constant 0.000000e+00 : f32
      %50 = vector.broadcast %cst_29 : f32 to vector<1x1x128xf32>
      %c0_30 = arith.constant 0 : index
      %c0_31 = arith.constant 0 : index
      %c0_32 = arith.constant 0 : index
      %51 = vector.load %arg5[%c0_30, %c0_31, %c0_32] : memref<1x1x128xf32, #tpu.memory_space<vmem>>, vector<1x1x128xf32>
      tpu.vector_store %arg5[%c0_30, %c0_31, %c0_32], %50 {strides = array<i32>} : memref<1x1x128xf32, #tpu.memory_space<vmem>>, vector<1x1x128xf32>,
      %cst_33 = arith.constant 0.000000e+00 : f32
      %52 = vector.broadcast %cst_33 : f32 to vector<1x1x128xf32>
      %c0_34 = arith.constant 0 : index
      %c0_35 = arith.constant 0 : index
      %c0_36 = arith.constant 0 : index
      %53 = vector.load %arg6[%c0_34, %c0_35, %c0_36] : memref<1x1x128xf32, #tpu.memory_space<vmem>>, vector<1x1x128xf32>
      tpu.vector_store %arg6[%c0_34, %c0_35, %c0_36], %52 {strides = array<i32>} : memref<1x1x128xf32, #tpu.memory_space<vmem>>, vector<1x1x128xf32>,
    } else {
    }
    %c0_15 = arith.constant 0 : index
    %c0_16 = arith.constant 0 : index
    %c0_17 = arith.constant 0 : index
    %37 = vector.load %arg5[%c0_15, %c0_16, %c0_17] : memref<1x1x128xf32, #tpu.memory_space<vmem>>, vector<1x1x128xf32>
    %cst_18 = arith.constant dense<0.000000e+00> : vector<128xf32>
    %38 = vector.multi_reduction <add>, %33, %cst_18 [0] : vector<16x128xf32> to vector<128xf32>
    %39 = vector.shape_cast %38 : vector<128xf32> to vector<1x128xf32>
    %40 = vector.shape_cast %39 : vector<1x128xf32> to vector<1x1x128xf32>
    %41 = arith.addf %37, %40 : vector<1x1x128xf32>
    %c0_19 = arith.constant 0 : index
    %c0_20 = arith.constant 0 : index
    %c0_21 = arith.constant 0 : index
    %42 = vector.load %arg5[%c0_19, %c0_20, %c0_21] : memref<1x1x128xf32, #tpu.memory_space<vmem>>, vector<1x1x128xf32>
    tpu.vector_store %arg5[%c0_19, %c0_20, %c0_21], %41 {strides = array<i32>} : memref<1x1x128xf32, #tpu.memory_space<vmem>>, vector<1x1x128xf32>,
    %c0_22 = arith.constant 0 : index
    %c0_23 = arith.constant 0 : index
    %c0_24 = arith.constant 0 : index
    %43 = vector.load %arg6[%c0_22, %c0_23, %c0_24] : memref<1x1x128xf32, #tpu.memory_space<vmem>>, vector<1x1x128xf32>
    %44 = arith.mulf %33, %33 : vector<16x128xf32>
    %cst_25 = arith.constant dense<0.000000e+00> : vector<128xf32>
    %45 = vector.multi_reduction <add>, %44, %cst_25 [0] : vector<16x128xf32> to vector<128xf32>
    %46 = vector.shape_cast %45 : vector<128xf32> to vector<1x128xf32>
    %47 = vector.shape_cast %46 : vector<1x128xf32> to vector<1x1x128xf32>
    %48 = arith.addf %43, %47 : vector<1x1x128xf32>
    %c0_26 = arith.constant 0 : index
    %c0_27 = arith.constant 0 : index
    %c0_28 = arith.constant 0 : index
    %49 = vector.load %arg6[%c0_26, %c0_27, %c0_28] : memref<1x1x128xf32, #tpu.memory_space<vmem>>, vector<1x1x128xf32>
    tpu.vector_store %arg6[%c0_26, %c0_27, %c0_28], %48 {strides = array<i32>} : memref<1x1x128xf32, #tpu.memory_space<vmem>>, vector<1x1x128xf32>,
    return
  }
  func.func @transform_0(%arg0: i32, %arg1: i32) -> (i32, i32, i32) {
    %c0_i32 = arith.constant 0 : i32
    %c0_i32_0 = arith.constant 0 : i32
    return %arg0, %arg1, %c0_i32 : i32, i32, i32
  }
  func.func @transform_1(%arg0: i32, %arg1: i32) -> (i32, i32) {
    %c0_i32 = arith.constant 0 : i32
    %c0_i32_0 = arith.constant 0 : i32
    %c0_i32_1 = arith.constant 0 : i32
    return %c0_i32, %c0_i32_0 : i32, i32
  }
  func.func @transform_2(%arg0: i32, %arg1: i32) -> (i32, i32, i32) {
    %c0_i32 = arith.constant 0 : i32
    %c0_i32_0 = arith.constant 0 : i32
    return %arg0, %arg1, %c0_i32 : i32, i32, i32
  }
  func.func @transform_3(%arg0: i32, %arg1: i32) -> (i32, i32, i32) {
    %c0_i32 = arith.constant 0 : i32
    %c0_i32_0 = arith.constant 0 : i32
    %c0_i32_1 = arith.constant 0 : i32
    return %arg0, %c0_i32, %c0_i32_0 : i32, i32, i32
  }
  func.func @transform_4(%arg0: i32, %arg1: i32) -> (i32, i32, i32) {
    %c0_i32 = arith.constant 0 : i32
    %c0_i32_0 = arith.constant 0 : i32
    %c0_i32_1 = arith.constant 0 : i32
    return %arg0, %c0_i32, %c0_i32_0 : i32, i32, i32
  }
}

module attributes {stable_mosaic.version = 11 : i64} {
  func.func @_bn_apply_kernel(%arg0: i32, %arg1: i32, %arg2: memref<1x16x128xf32, #tpu.memory_space<vmem>>, %arg3: memref<2x128xf32, #tpu.memory_space<vmem>>, %arg4: memref<1x16x128xf32, #tpu.memory_space<vmem>>) attributes {dimension_semantics = [#tpu.dimension_semantics<parallel>, #tpu.dimension_semantics<parallel>], iteration_bounds = array<i64: 2, 3>, scalar_prefetch = 0 : i64, scratch_operands = 0 : i64, tpu.core_type = #tpu.core_type<tc>, window_params = [{transform_indices = @transform_0, window_bounds = array<i64: 1, 16, 128>}, {pipeline_mode = #tpu.pipeline_mode<synchronous>, transform_indices = @transform_1, window_bounds = array<i64: 2, 128>}, {transform_indices = @transform_2, window_bounds = array<i64: 1, 16, 128>}]} {
    %c0 = arith.constant 0 : index
    %c0_0 = arith.constant 0 : index
    %0 = vector.load %arg3[%c0, %c0_0] : memref<2x128xf32, #tpu.memory_space<vmem>>, vector<2x128xf32>
    %1 = vector.extract_strided_slice %0 {offsets = [0, 0], sizes = [1, 128], strides = [1, 1]} : vector<2x128xf32> to vector<1x128xf32>
    %2 = vector.shape_cast %1 : vector<1x128xf32> to vector<1x1x128xf32>
    %3 = vector.extract_strided_slice %0 {offsets = [1, 0], sizes = [1, 128], strides = [1, 1]} : vector<2x128xf32> to vector<1x128xf32>
    %4 = vector.shape_cast %3 : vector<1x128xf32> to vector<1x1x128xf32>
    %c0_1 = arith.constant 0 : index
    %c0_2 = arith.constant 0 : index
    %c0_3 = arith.constant 0 : index
    %5 = vector.load %arg2[%c0_1, %c0_2, %c0_3] : memref<1x16x128xf32, #tpu.memory_space<vmem>>, vector<1x16x128xf32>
    %6 = vector.broadcast %2 : vector<1x1x128xf32> to vector<1x16x128xf32>
    %7 = arith.mulf %5, %6 : vector<1x16x128xf32>
    %8 = vector.broadcast %4 : vector<1x1x128xf32> to vector<1x16x128xf32>
    %9 = arith.addf %7, %8 : vector<1x16x128xf32>
    %c0_4 = arith.constant 0 : index
    %c0_5 = arith.constant 0 : index
    %c0_6 = arith.constant 0 : index
    %10 = vector.load %arg4[%c0_4, %c0_5, %c0_6] : memref<1x16x128xf32, #tpu.memory_space<vmem>>, vector<1x16x128xf32>
    tpu.vector_store %arg4[%c0_4, %c0_5, %c0_6], %9 {strides = array<i32>} : memref<1x16x128xf32, #tpu.memory_space<vmem>>, vector<1x16x128xf32>,
    return
  }
  func.func @transform_0(%arg0: i32, %arg1: i32) -> (i32, i32, i32) {
    %c0_i32 = arith.constant 0 : i32
    %c0_i32_0 = arith.constant 0 : i32
    return %arg0, %arg1, %c0_i32 : i32, i32, i32
  }
  func.func @transform_1(%arg0: i32, %arg1: i32) -> (i32, i32) {
    %c0_i32 = arith.constant 0 : i32
    %c0_i32_0 = arith.constant 0 : i32
    %c0_i32_1 = arith.constant 0 : i32
    return %c0_i32, %c0_i32_0 : i32, i32
  }
  func.func @transform_2(%arg0: i32, %arg1: i32) -> (i32, i32, i32) {
    %c0_i32 = arith.constant 0 : i32
    %c0_i32_0 = arith.constant 0 : i32
    return %arg0, %arg1, %c0_i32 : i32, i32, i32
  }
}

</mosaic_0001>

<bundles_post_ra>
// kernel: batch_norm_conv.2
= control target key start
LH: loop header
LB: loop body
LE: loop exit
PB: predicated region body
PF: predicated region fallthrough
CT: control target
= control target key end

     0   :  { %s698_s15 = smov 0   ;;  %s700_s16 = smov 0   ;;  %s776_s0 = inlined_call_operand.vmem [shape: f32[2,48,12], index: 0, kind: input, shape index: {}]   ;;  %s777_s1 = inlined_call_operand.vmem [shape: f32[12,128], index: 1, kind: input, shape index: {}]   ;;  %s778_s2 = inlined_call_operand.vmem [shape: f32[2,48,128], index: 2, kind: output, shape index: {0}]   ;;  %s779_s3 = inlined_call_operand.vmem [shape: f32[2,1,128], index: 3, kind: output, shape index: {1}]   ;;  %s780_s4 = inlined_call_operand.vmem [shape: f32[2,1,128], index: 4, kind: output, shape index: {2}]  }
   0x1   :  { %s702_s17 = smov 0   ;;  %s704_s18 = smov 0  }
   0x2   :  { %s706_s19 = smov 0  }
   0x3 LB: > { %s24_s20 = sadd.s32 1, %s661_s17  ;;  %s27_s21 = sadd.s32 1, %s665_s18  ;;  %s669_s19 = sphi %s706_s19, %s15_s19   ;;  %s665_s18 = sphi %s704_s18, %s784_s18   ;;  %s661_s17 = sphi %s702_s17, %s783_s17   ;;  %s657_s16 = sphi %s700_s16, %s782_s16   ;;  %s653_s15 = sphi %s698_s15, %s781_s15  }
   0x4   : > { %p25_p0 = scmp.ge.s32.totalorder %s24_s20, 3  ;;  %p559_p1 = scmp.ge.s32.totalorder %s669_s19, 1 }
   0x5   : > { %p188_p2 = scmp.lt.s32.totalorder %s669_s19, 7 }
   0x6   : > { %s786_s20 = smov (%p25_p0, %s24_s20), 0  ;;  %s788_s21 = smov (!%p25_p0, %s27_s21), %s665_s18 }
   0x7   : > { %p189_p3 = pnand %p559_p1, %p188_p2  ;;  %p29_p4 = scmp.ge.s32.totalorder %s788_s21, 2 }
   0x8   : > { %v256_v0 = vld [vmem:[%s777_s1] sm:$0xff] (!%p189_p3)  ;;  %v257_v1 = vld [vmem:[%s777_s1 + $0x8] sm:$0xf] (!%p189_p3)  ;;  %vm265_vm0 = vcmask (!%p189_p3), 1043456   ;;  %s560_s26 = sshll.u32 (!%p189_p3), %s653_s15, 1  ;;  %vm671_vm1 = vmmov (!%p189_p3), 1   ;;  %v348_v5 = vlaneseq (!%p189_p3) }
   0x9   : > { %s790_s21 = smov (%p29_p4, %s788_s21), 0  ;;  %192 = sbr.rel (%p189_p3) target bundleno = 259 (0x103), region = 28 }
   0xa   : > { %v582_v2 = vpack.c.bf16 (!%p189_p3), %v257_v1, %v256_v0  ;;  %vm583_vm2 = vmpackc.low (!%p189_p3), %vm265_vm0, %vm671_vm1  ;;  %p229_p5 = scmp.lt.s32.totalorder (!%p189_p3), %s657_s16, 1  ;;  %p231_p6 = scmp.lt.s32.totalorder (!%p189_p3), %s560_s26, 5  ;;  %vm258_vm3 = vcmask (!%p189_p3), 97280   ;;  %v349_v6 = vshrl.u32 (!%p189_p3), %v348_v5, 7 }
   0xb   : > { %s567_s13 = sshll.u32 (!%p189_p3), %s653_s15, 4  ;;  %p568_p7 = scmp.ne.s32.totalorder (!%p189_p3), %s653_s15, 0 }
   0xc   : > { %584 = vmatprep.subr.msk.bf16.mxu0 (!%p189_p3), %vm583_vm2, %v582_v2  ;;  %v350_v7 = vadd.s32 (!%p189_p3), 8, %v349_v6  ;;  %v376_v9 = vstv (!%p189_p3), %s567_s13  ;;  %v355_v10 = vand.u32 (!%p189_p3), 15, %v349_v6 }
   0xd   : > { %587 = vmatpush3.bf16.msk.msra.mxu0 (!%p189_p3), %vm583_vm2, %v582_v2 }
   0xe   : > { %v362_v8 = vand.u32 (!%p189_p3), 15, %v350_v7  ;;  %v377_v12 = vadd.s32 (!%p189_p3), %v376_v9, %v355_v10 }
  0x10   : > { %s792_s16 = smov (!%p229_p5, %s657_s16), 1  ;;  %s794_s26 = smov (!%p231_p6, %s560_s26), 5  ;;  %v378_v11 = vadd.s32 %v376_v9, %v362_v8  ;;  %vm379_vm5 = vcmp.lt.s32.totalorder %v377_v12, 40 }
  0x11   : > { %s588_s27 = smul.u32 6, %s792_s16  ;;  %s740_s30 = scalar_lea.vmem %s779_s3, %s792_s16  ;;  %v672_v19 = vmov (!%p568_p7), 0.0  }
  0x12   : > { %s745_s7 = scalar_lea.vmem %s780_s4, %s792_s16  ;;  %vm380_vm4 = vcmp.lt.s32.totalorder %v378_v11, 40  ;;  %391 = vst [vmem:[%s740_s30] sm:$0x1] (!%p568_p7), %v672_v19 }
  0x13   : > { %s234_s8 = sadd.s32 %s588_s27, %s794_s26  ;;  %392 = vst [vmem:[%s745_s7] sm:$0x1] (!%p568_p7), %v672_v19 }
  0x14   : > { %s561_s9 = sshll.u32 %s234_s8, 3 }
  0x15   : > { %s236_s12 = scalar_lea.vmem %s776_s0, %s561_s9  ;;  %s246_s22 = scalar_lea.vmem %s778_s2, %s561_s9 }
  0x16   : > { %v254_v3 = vld [vmem:[%s236_s12] sm:$0xff]  ;;  %v255_v4 = vld [vmem:[%s236_s12 + $0x8] sm:$0xff] }
  0x17   : > { %579 = vmatprep.mubr.msk.f32.mxu0 %vm258_vm3, %v254_v3 }
  0x18   : > { %580 = vmatmul.mubr.msk.f32.vlgmr.msra.gmra.mrb[0].mxu0 %vm258_vm3, %v255_v4 }
  0xe9   : > { %390 = sbr.rel (%p568_p7) target bundleno = 240 (0xf0), region = 32 }
  0xeb   : > { %v581_v13 = vpop.f32.mrb[0].mxu0 }
  0xec   : > { %v345_v14 = vmax.f32 %v581_v13, 0.0  ;;  %v335_v15 = vpop.f32.mrb[1].mxu0 }
  0xed   : > { %v344_v16 = vmax.f32 %v335_v15, 0.0 }
  0xee   : > { %347 = vst [vmem:[%s246_s22 + $0x8] sm:$0xff] %v345_v14  ;;  %v386_v17 = vsel %vm380_vm4, %v345_v14, 0.0 }
  0xef   : > { %346 = vst [vmem:[%s246_s22] sm:$0xff] %v344_v16  ;;  %v385_v18 = vsel %vm379_vm5, %v344_v16, 0.0 }
  0xf0 PF: > { %v394_v20 = vadd.f32 %v386_v17, %v385_v18  ;;  %v404_v21 = vmul.f32 %v385_v18, %v385_v18  ;;  %v405_v22 = vmul.f32 %v386_v17, %v386_v17  ;;  %v393_v33 = vld [vmem:[%s740_s30] sm:$0x1] }
  0xf1   : > { %v403_v36 = vld [vmem:[%s745_s7] sm:$0x1] }
  0xf2   : > { %v395_v23 = vrot.slane %v394_v20, 4  ;;  %v406_v24 = vadd.f32 %v405_v22, %v404_v21 }
  0xf4   : > { %v396_v25 = vadd.f32 %v395_v23, %v394_v20  ;;  %v407_v26 = vrot.slane %v406_v24, 4 }
  0xf6   : > { %v397_v27 = vrot.slane %v396_v25, 2  ;;  %v408_v28 = vadd.f32 %v407_v26, %v406_v24 }
  0xf8   : > { %v398_v29 = vadd.f32 %v397_v27, %v396_v25  ;;  %v409_v30 = vrot.slane %v408_v28, 2 }
  0xfa   : > { %v399_v31 = vrot.slane %v398_v29, 1  ;;  %v410_v32 = vadd.f32 %v409_v30, %v408_v28 }
  0xfc   : > { %v400_v34 = vadd.f32 %v399_v31, %v398_v29  ;;  %v411_v35 = vrot.slane %v410_v32, 1 }
  0xfe   : > { %v401_v37 = vadd.f32 %v400_v34, %v393_v33  ;;  %v412_v38 = vadd.f32 %v411_v35, %v410_v32 }
 0x100   : > { %402 = vst [vmem:[%s740_s30] sm:$0x1] %v401_v37  ;;  %v413_v39 = vadd.f32 %v412_v38, %v403_v36 }
 0x102   : > { %414 = vst [vmem:[%s745_s7] sm:$0x1] %v413_v39 }
 0x103 PF: > { %s15_s19 = sadd.s32 1, %s669_s19   ;;  %s781_s15 = smov %s661_s17 }
 0x104   : > { %p12_p8 = scmp.ge.s32.totalorder %s15_s19, 8   ;;  %s782_s16 = smov %s665_s18 }
 0x105   : > { %s783_s17 = smov %s786_s20  ;;  %s784_s18 = smov %s790_s21 }
 0x106   :  { %14 = sbr.rel (!%p12_p8) target bundleno = 3 (0x3), region = 86 }

// kernel: batch_norm_conv.3
= control target key start
LH: loop header
LB: loop body
LE: loop exit
PB: predicated region body
PF: predicated region fallthrough
CT: control target
= control target key end

     0   :  { %s397_s9 = smov 0   ;;  %s399_s10 = smov 0   ;;  %s451_s0 = inlined_call_operand.vmem [shape: f32[2,48,128], index: 0, kind: input, shape index: {}, may-alias: {0,2}]   ;;  %s452_s1 = inlined_call_operand.vmem [shape: f32[2,128], index: 1, kind: input, shape index: {}]   ;;  %s453_s2 = inlined_call_operand.vmem [shape: f32[2,48,128], index: 2, kind: output, shape index: {}, may-alias: {0,2}]  }
   0x1   :  { %s401_s11 = smov 0   ;;  %s403_s12 = smov 0  }
   0x2   :  { %s405_s13 = smov 0  }
   0x3 LB: > { %s21_s14 = sadd.s32 1, %s372_s11  ;;  %s24_s15 = sadd.s32 1, %s376_s12  ;;  %s380_s13 = sphi %s405_s13, %s12_s13   ;;  %s376_s12 = sphi %s403_s12, %s457_s12   ;;  %s372_s11 = sphi %s401_s11, %s456_s11   ;;  %s368_s10 = sphi %s399_s10, %s455_s10   ;;  %s364_s9 = sphi %s397_s9, %s454_s9  }
   0x4   : > { %p22_p0 = scmp.ge.s32.totalorder %s21_s14, 3  ;;  %p294_p1 = scmp.ge.s32.totalorder %s380_s13, 1 }
   0x5   : > { %p133_p2 = scmp.lt.s32.totalorder %s380_s13, 7 }
   0x6   : > { %s459_s14 = smov (%p22_p0, %s21_s14), 0  ;;  %s461_s15 = smov (!%p22_p0, %s24_s15), %s376_s12 }
   0x7   : > { %p134_p3 = pnand %p294_p1, %p133_p2  ;;  %p26_p4 = scmp.ge.s32.totalorder %s461_s15, 2 }
   0x8   : > { %s295_s16 = sshll.u32 (!%p134_p3), %s364_s9, 1  ;;  %p164_p5 = scmp.lt.s32.totalorder (!%p134_p3), %s368_s10, 1  ;;  %v186_v0 = vlaneseq (!%p134_p3)  ;;  %v183_v2 = vld [vmem:[%s452_s1] sm:$0x3] (!%p134_p3) }
   0x9   : > { %s463_s15 = smov (%p26_p4, %s461_s15), 0  ;;  %137 = sbr.rel (%p134_p3) target bundleno = 28 (0x1c), region = 28 }
   0xa   : > { %p166_p6 = scmp.lt.s32.totalorder (!%p134_p3), %s295_s16, 5  ;;  %v187_v1 = vshrl.u32 (!%p134_p3), %v186_v0, 7 }
   0xc   : > { %v188_v3 = vsub.s32 (!%p134_p3), 0, %v187_v1  ;;  %v194_v4 = vsub.s32 (!%p134_p3), 1, %v187_v1 }
   0xe   : > { %v189_v5 = vrot.slane (!%p134_p3), %v183_v2, %v188_v3  ;;  %v195_v6 = vrot.slane (!%p134_p3), %v183_v2, %v194_v4 }
  0x10   : > { %s465_s10 = smov (!%p164_p5, %s368_s10), 1  ;;  %s467_s16 = smov (!%p166_p6, %s295_s16), 5 }
  0x11   : > { %s301_s19 = smul.u32 6, %s465_s10 }
  0x13   : > { %s169_s20 = sadd.s32 %s301_s19, %s467_s16 }
  0x14   : > { %s296_s21 = sshll.u32 %s169_s20, 3 }
  0x15   : > { %s171_s24 = scalar_lea.vmem %s451_s0, %s296_s21  ;;  %s181_s27 = scalar_lea.vmem %s453_s2, %s296_s21 }
  0x16   : > { %v184_v7 = vld [vmem:[%s171_s24] sm:$0xff]  ;;  %v185_v8 = vld [vmem:[%s171_s24 + $0x8] sm:$0xff] }
  0x17   : > { %v190_v9 = vmul.f32 %v189_v5, %v184_v7  ;;  %v191_v10 = vmul.f32 %v189_v5, %v185_v8 }
  0x19   : > { %v196_v11 = vadd.f32 %v195_v6, %v190_v9  ;;  %v197_v12 = vadd.f32 %v195_v6, %v191_v10 }
  0x1b   : > { %198 = vst [vmem:[%s181_s27] sm:$0xff] %v196_v11  ;;  %199 = vst [vmem:[%s181_s27 + $0x8] sm:$0xff] %v197_v12 }
  0x1c PF: > { %s12_s13 = sadd.s32 1, %s380_s13   ;;  %s454_s9 = smov %s372_s11 }
  0x1d   : > { %p9_p7 = scmp.ge.s32.totalorder %s12_s13, 8   ;;  %s455_s10 = smov %s376_s12 }
  0x1e   : > { %s456_s11 = smov %s459_s14  ;;  %s457_s12 = smov %s463_s15 }
  0x1f   :  { %11 = sbr.rel (!%p9_p7) target bundleno = 3 (0x3), region = 58 }

</bundles_post_ra>
